<compile_context>
chip_gen: v5e
topology: v5e:2x2
jax: 0.10.0
libtpu: 0.0.40
codegen_flags: <defaults>
</compile_context>

<pallas_src>
import functools

import jax
import jax.numpy as jnp
from jax.experimental import pallas as pl
from jax.experimental.pallas import tpu as pltpu

_LANES = 128      # padded feature width of all slabs
_ROW_PAD = 8      # padded node-row count (sublane tile)


# ---------------------------------------------------------------- kernel body
def gcn_network_kernel(x_ref, adjb_ref, w_ref, b_ref, out_ref, *, n_nodes):
    # x_ref    : (8, 128) f32   zero-padded node features
    # adjb_ref : (n_nodes, 8, 128) f32   block k = adj[:, k] splatted across lanes
    # w_ref    : (384, 128) bf16  three zero-padded weight blocks
    # b_ref    : (8, 128) f32    rows 0..2 = b1, b2, b3
    x = x_ref[...]                                  # (8, 128) f32

    # Hoist the adj lane-broadcast blocks once (reused by all 3 layers).
    adj_blocks = [adjb_ref[k] for k in range(n_nodes)]

    def adj_apply(s):
        # out[i, :] = sum_k adj[i, k] * s[k, :]  — unrolled full-vreg VPU MACs (f32)
        acc = adj_blocks[0] * s[0:1, :]
        for k in range(1, n_nodes):
            acc = acc + adj_blocks[k] * s[k:k + 1, :]
        return acc

    w1 = w_ref[0:128, :]        # nonzero block (16, 64)
    w2 = w_ref[128:256, :]      # nonzero block (64, 128)
    w3 = w_ref[256:384, :]      # nonzero block (128, 10)
    b1 = b_ref[0:1, :]
    b2 = b_ref[1:2, :]
    b3 = b_ref[2:3, :]

    # Layer 1 (reassociated): (adj @ x) @ W1 + b1, ReLU   — adj contraction at the
    # narrowest width; MXU gets native bf16 operands, accumulates f32.
    ax = adj_apply(x)                                                        # VPU f32
    h1 = jnp.maximum(
        jnp.dot(ax.astype(jnp.bfloat16), w1, preferred_element_type=jnp.float32)
        + b1, 0.0)                                                           # MXU + VPU f32

    # Layer 2: adj @ (h1 @ W2) + b2, ReLU
    s2 = jnp.dot(h1.astype(jnp.bfloat16), w2, preferred_element_type=jnp.float32)
    h2 = jnp.maximum(adj_apply(s2) + b2, 0.0)

    # Layer 3: adj @ (h2 @ W3) + b3 (no activation); lane-dense (8,128) store.
    s3 = jnp.dot(h2.astype(jnp.bfloat16), w3, preferred_element_type=jnp.float32)
    out_ref[...] = (adj_apply(s3) + b3).astype(out_ref.dtype)


# ------------------------------------------------------------- packing helpers
def _pad_rows(a, rows):
    out = jnp.zeros((rows, _LANES), jnp.float32)
    return out.at[: a.shape[0], : a.shape[1]].set(a.astype(jnp.float32))


def pack_params(params):
    """Pack params ONCE (outside the per-call path).

    Returns:
      w_slab: (384, 128) bf16  — three zero-padded weight blocks
      b_slab: (8, 128)  f32    — rows 0..2 = b1, b2, b3
    """
    w1, b1, w2, b2, w3, b3 = params
    w_slab = jnp.concatenate(
        [_pad_rows(w1, 128), _pad_rows(w2, 128), _pad_rows(w3, 128)], axis=0
    ).astype(jnp.bfloat16)
    b_slab = jnp.zeros((_ROW_PAD, _LANES), jnp.float32)
    b_slab = b_slab.at[0, : b1.shape[1]].set(b1[0].astype(jnp.float32))
    b_slab = b_slab.at[1, : b2.shape[1]].set(b2[0].astype(jnp.float32))
    b_slab = b_slab.at[2, : b3.shape[1]].set(b3[0].astype(jnp.float32))
    return w_slab, b_slab


def _pack_data(x, adj):
    """x (N,16), adj (N,N) -> x_slab (8,128) f32, adjb (N,8,128) f32 (lane-broadcast cols)."""
    n, f_in = x.shape
    x_slab = jnp.zeros((_ROW_PAD, _LANES), jnp.float32).at[:n, :f_in].set(
        x.astype(jnp.float32))
    # adjb[k, i, :] = adj[i, k] for i < n, else 0.
    adjb = jnp.zeros((n, _ROW_PAD, _LANES), jnp.float32).at[:, :n, :].set(
        jnp.broadcast_to(adj.T.astype(jnp.float32)[:, :, None], (n, n, _LANES)))
    return x_slab, adjb


def _cost_estimate(n_nodes, batch):
    flops = batch * (2 * _ROW_PAD * _LANES * _LANES * 3
                     + 2 * 3 * n_nodes * _ROW_PAD * _LANES)
    bytes_accessed = (384 * _LANES * 2                              # bf16 weights
                      + _ROW_PAD * _LANES * 4                        # f32 biases
                      + batch * (_ROW_PAD * _LANES * 4               # x slab
                                 + n_nodes * _ROW_PAD * _LANES * 4   # adj broadcast
                                 + _ROW_PAD * _LANES * 4))           # output
    return pl.CostEstimate(flops=flops, transcendentals=0,
                           bytes_accessed=bytes_accessed)


# ----------------------------------------------------------------- forwards
@functools.partial(jax.jit, static_argnames=("n_out",))
def gcn_forward(x, adj, w_slab, b_slab, n_out=10):
    """Single graph: x (N,16) f32, adj (N,N) f32 -> (N, n_out) f32."""
    n, f_in = x.shape
    assert n <= _ROW_PAD, f"n_nodes={n} exceeds padded row tile {_ROW_PAD}"
    assert f_in <= _LANES and n_out <= _LANES
    x_slab, adjb = _pack_data(x, adj)
    vmem = pl.BlockSpec(memory_space=pltpu.MemorySpace.VMEM)
    out_pad = pl.pallas_call(
        functools.partial(gcn_network_kernel, n_nodes=n),
        out_shape=jax.ShapeDtypeStruct((_ROW_PAD, _LANES), jnp.float32),
        in_specs=[vmem, vmem, vmem, vmem],
        out_specs=vmem,
        cost_estimate=_cost_estimate(n, 1),
    )(x_slab, adjb, w_slab, b_slab)
    return out_pad[:n, :n_out]


@functools.partial(jax.jit, static_argnames=("n_out",))
def gcn_forward_batched(xs, adjs, w_slab, b_slab, n_out=10):
    """B graphs in one launch: xs (B,N,16), adjs (B,N,N) -> (B,N,n_out).

    Batch is a parallel grid axis (shards across v7x's two TensorCores); the param
    slabs use a constant index_map so they stay resident across the grid.
    """
    bsz, n, f_in = xs.shape
    assert n <= _ROW_PAD and f_in <= _LANES and n_out <= _LANES
    x_slab, adjb = jax.vmap(_pack_data)(xs, adjs)      # (B,8,128), (B,n,8,128)
    out_pad = pl.pallas_call(
        functools.partial(gcn_network_kernel, n_nodes=n),
        out_shape=jax.ShapeDtypeStruct((bsz, _ROW_PAD, _LANES), jnp.float32),
        grid=(bsz,),
        in_specs=[
            pl.BlockSpec((None, _ROW_PAD, _LANES), lambda b: (b, 0, 0)),
            pl.BlockSpec((None, n, _ROW_PAD, _LANES), lambda b: (b, 0, 0, 0)),
            pl.BlockSpec((3 * _LANES, _LANES), lambda b: (0, 0)),
            pl.BlockSpec((_ROW_PAD, _LANES), lambda b: (0, 0)),
        ],
        out_specs=pl.BlockSpec((None, _ROW_PAD, _LANES), lambda b: (b, 0, 0)),
        compiler_params=pltpu.CompilerParams(dimension_semantics=("parallel",)),
        cost_estimate=_cost_estimate(n, bsz),
    )(x_slab, adjb, w_slab, b_slab)
    return out_pad[:, :n, :n_out]


# ----------------------------------------------------------------- reference
def init_params(key):
    """Deterministic synthetic params matching GraphConvolutionLayer(16,64)/(64,128)/(128,10)."""
    ks = jax.random.split(key, 6)

    def glorot(k, fan_in, fan_out):
        scale = (6.0 / (fan_in + fan_out)) ** 0.5
        return jax.random.uniform(k, (fan_in, fan_out), jnp.float32, -scale, scale)

    w1 = glorot(ks[0], 16, 64)
    b1 = jax.random.normal(ks[1], (1, 64), jnp.float32) * 0.01
    w2 = glorot(ks[2], 64, 128)
    b2 = jax.random.normal(ks[3], (1, 128), jnp.float32) * 0.01
    w3 = glorot(ks[4], 128, 10)
    b3 = jax.random.normal(ks[5], (1, 10), jnp.float32) * 0.01
    return (w1, b1, w2, b2, w3, b3)


def gcn_forward_ref(x, adj, params):
    """Pure-JAX f32 reference."""
    w1, b1, w2, b2, w3, b3 = params
    h = jnp.maximum(adj @ (x @ w1) + b1, 0.0)
    h = jnp.maximum(adj @ (h @ w2) + b2, 0.0)
    return adj @ (h @ w3) + b3


if __name__ == "__main__":
    key = jax.random.PRNGKey(0)
    k_x, k_adj, k_p, k_b = jax.random.split(key, 4)

    N = 5   # number of graph nodes (matches adj = torch.randn((5, 5)))
    x = jax.random.normal(k_x, (N, 16), jnp.float32)
    adj = jax.random.normal(k_adj, (N, N), jnp.float32)
    params = init_params(k_p)

    # Pack params ONCE (hoisted out of the per-call path).
    w_slab, b_slab = pack_params(params)

    # Single-graph forward (grid-less, launch/DMA-overhead bound).
    out = jax.block_until_ready(gcn_forward(x, adj, w_slab, b_slab))
    ref = gcn_forward_ref(x, adj, params)
    assert out.shape == (N, 10), out.shape
    # bf16 weights/MXU operands -> looser tolerance than f32 (expected, not a bug).
    assert jnp.allclose(out, ref, atol=1e-1, rtol=5e-2), "mismatch vs reference (single)"

    # Batched forward: B graphs per launch, parallel grid axis.
    B = 4
    xs = jax.random.normal(k_b, (B, N, 16), jnp.float32)
    adjs = jax.random.normal(jax.random.fold_in(k_b, 1), (B, N, N), jnp.float32)
    outs = jax.block_until_ready(gcn_forward_batched(xs, adjs, w_slab, b_slab))
    refs = jax.vmap(lambda xi, ai: gcn_forward_ref(xi, ai, params))(xs, adjs)
    assert outs.shape == (B, N, 10), outs.shape
    assert jnp.allclose(outs, refs, atol=1e-1, rtol=5e-2), "mismatch vs reference (batched)"

    print("KERNEL_OK")
</pallas_src>

<mosaic_0001>
module attributes {stable_mosaic.version = 11 : i64} {
  func.func @gcn_network_kernel(%arg0: memref<8x128xf32, #tpu.memory_space<vmem>>, %arg1: memref<5x8x128xf32, #tpu.memory_space<vmem>>, %arg2: memref<384x128xbf16, #tpu.memory_space<vmem>>, %arg3: memref<8x128xf32, #tpu.memory_space<vmem>>, %arg4: memref<8x128xf32, #tpu.memory_space<vmem>>) attributes {dimension_semantics = [], scalar_prefetch = 0 : i64, scratch_operands = 0 : i64, tpu.core_type = #tpu.core_type<tc>} {
    %c0 = arith.constant 0 : index
    %c0_0 = arith.constant 0 : index
    %0 = vector.load %arg0[%c0, %c0_0] : memref<8x128xf32, #tpu.memory_space<vmem>>, vector<8x128xf32>
    %c0_1 = arith.constant 0 : index
    %c0_2 = arith.constant 0 : index
    %c0_3 = arith.constant 0 : index
    %1 = vector.load %arg1[%c0_1, %c0_2, %c0_3] : memref<5x8x128xf32, #tpu.memory_space<vmem>>, vector<1x8x128xf32>
    %2 = vector.shape_cast %1 : vector<1x8x128xf32> to vector<8x128xf32>
    %c1 = arith.constant 1 : index
    %c0_4 = arith.constant 0 : index
    %c0_5 = arith.constant 0 : index
    %3 = vector.load %arg1[%c1, %c0_4, %c0_5] : memref<5x8x128xf32, #tpu.memory_space<vmem>>, vector<1x8x128xf32>
    %4 = vector.shape_cast %3 : vector<1x8x128xf32> to vector<8x128xf32>
    %c2 = arith.constant 2 : index
    %c0_6 = arith.constant 0 : index
    %c0_7 = arith.constant 0 : index
    %5 = vector.load %arg1[%c2, %c0_6, %c0_7] : memref<5x8x128xf32, #tpu.memory_space<vmem>>, vector<1x8x128xf32>
    %6 = vector.shape_cast %5 : vector<1x8x128xf32> to vector<8x128xf32>
    %c3 = arith.constant 3 : index
    %c0_8 = arith.constant 0 : index
    %c0_9 = arith.constant 0 : index
    %7 = vector.load %arg1[%c3, %c0_8, %c0_9] : memref<5x8x128xf32, #tpu.memory_space<vmem>>, vector<1x8x128xf32>
    %8 = vector.shape_cast %7 : vector<1x8x128xf32> to vector<8x128xf32>
    %c4 = arith.constant 4 : index
    %c0_10 = arith.constant 0 : index
    %c0_11 = arith.constant 0 : index
    %9 = vector.load %arg1[%c4, %c0_10, %c0_11] : memref<5x8x128xf32, #tpu.memory_space<vmem>>, vector<1x8x128xf32>
    %10 = vector.shape_cast %9 : vector<1x8x128xf32> to vector<8x128xf32>
    %c0_12 = arith.constant 0 : index
    %c0_13 = arith.constant 0 : index
    %11 = vector.load %arg2[%c0_12, %c0_13] : memref<384x128xbf16, #tpu.memory_space<vmem>>, vector<128x128xbf16>
    %c128 = arith.constant 128 : index
    %c0_14 = arith.constant 0 : index
    %12 = vector.load %arg2[%c128, %c0_14] : memref<384x128xbf16, #tpu.memory_space<vmem>>, vector<128x128xbf16>
    %c256 = arith.constant 256 : index
    %c0_15 = arith.constant 0 : index
    %13 = vector.load %arg2[%c256, %c0_15] : memref<384x128xbf16, #tpu.memory_space<vmem>>, vector<128x128xbf16>
    %c0_16 = arith.constant 0 : index
    %c0_17 = arith.constant 0 : index
    %14 = vector.load %arg3[%c0_16, %c0_17] : memref<8x128xf32, #tpu.memory_space<vmem>>, vector<1x128xf32>
    %c1_18 = arith.constant 1 : index
    %c0_19 = arith.constant 0 : index
    %15 = vector.load %arg3[%c1_18, %c0_19] : memref<8x128xf32, #tpu.memory_space<vmem>>, vector<1x128xf32>
    %c2_20 = arith.constant 2 : index
    %c0_21 = arith.constant 0 : index
    %16 = vector.load %arg3[%c2_20, %c0_21] : memref<8x128xf32, #tpu.memory_space<vmem>>, vector<1x128xf32>
    %17 = vector.extract_strided_slice %0 {offsets = [0, 0], sizes = [1, 128], strides = [1, 1]} : vector<8x128xf32> to vector<1x128xf32>
    %18 = vector.broadcast %17 : vector<1x128xf32> to vector<8x128xf32>
    %19 = arith.mulf %2, %18 : vector<8x128xf32>
    %20 = vector.extract_strided_slice %0 {offsets = [1, 0], sizes = [1, 128], strides = [1, 1]} : vector<8x128xf32> to vector<1x128xf32>
    %21 = vector.broadcast %20 : vector<1x128xf32> to vector<8x128xf32>
    %22 = arith.mulf %4, %21 : vector<8x128xf32>
    %23 = arith.addf %19, %22 : vector<8x128xf32>
    %24 = vector.extract_strided_slice %0 {offsets = [2, 0], sizes = [1, 128], strides = [1, 1]} : vector<8x128xf32> to vector<1x128xf32>
    %25 = vector.broadcast %24 : vector<1x128xf32> to vector<8x128xf32>
    %26 = arith.mulf %6, %25 : vector<8x128xf32>
    %27 = arith.addf %23, %26 : vector<8x128xf32>
    %28 = vector.extract_strided_slice %0 {offsets = [3, 0], sizes = [1, 128], strides = [1, 1]} : vector<8x128xf32> to vector<1x128xf32>
    %29 = vector.broadcast %28 : vector<1x128xf32> to vector<8x128xf32>
    %30 = arith.mulf %8, %29 : vector<8x128xf32>
    %31 = arith.addf %27, %30 : vector<8x128xf32>
    %32 = vector.extract_strided_slice %0 {offsets = [4, 0], sizes = [1, 128], strides = [1, 1]} : vector<8x128xf32> to vector<1x128xf32>
    %33 = vector.broadcast %32 : vector<1x128xf32> to vector<8x128xf32>
    %34 = arith.mulf %10, %33 : vector<8x128xf32>
    %35 = arith.addf %31, %34 : vector<8x128xf32>
    %36 = arith.truncf %35 : vector<8x128xf32> to vector<8x128xbf16>
    %cst = arith.constant dense<0.000000e+00> : vector<8x128xf32>
    %37 = tpu.matmul %36, %11, %cst {dimension_numbers = #tpu.dot_dimension_numbers<[1], [0], [0], [1], [0, 0, 1, 1], [], []>} : vector<8x128xbf16>, vector<128x128xbf16>, vector<8x128xf32> -> vector<8x128xf32>
    %38 = vector.broadcast %14 : vector<1x128xf32> to vector<8x128xf32>
    %39 = arith.addf %37, %38 : vector<8x128xf32>
    %cst_22 = arith.constant 0.000000e+00 : f32
    %40 = vector.broadcast %cst_22 : f32 to vector<8x128xf32>
    %41 = arith.maximumf %39, %40 : vector<8x128xf32>
    %42 = arith.truncf %41 : vector<8x128xf32> to vector<8x128xbf16>
    %cst_23 = arith.constant dense<0.000000e+00> : vector<8x128xf32>
    %43 = tpu.matmul %42, %12, %cst_23 {dimension_numbers = #tpu.dot_dimension_numbers<[1], [0], [0], [1], [0, 0, 1, 1], [], []>} : vector<8x128xbf16>, vector<128x128xbf16>, vector<8x128xf32> -> vector<8x128xf32>
    %44 = vector.extract_strided_slice %43 {offsets = [0, 0], sizes = [1, 128], strides = [1, 1]} : vector<8x128xf32> to vector<1x128xf32>
    %45 = vector.broadcast %44 : vector<1x128xf32> to vector<8x128xf32>
    %46 = arith.mulf %2, %45 : vector<8x128xf32>
    %47 = vector.extract_strided_slice %43 {offsets = [1, 0], sizes = [1, 128], strides = [1, 1]} : vector<8x128xf32> to vector<1x128xf32>
    %48 = vector.broadcast %47 : vector<1x128xf32> to vector<8x128xf32>
    %49 = arith.mulf %4, %48 : vector<8x128xf32>
    %50 = arith.addf %46, %49 : vector<8x128xf32>
    %51 = vector.extract_strided_slice %43 {offsets = [2, 0], sizes = [1, 128], strides = [1, 1]} : vector<8x128xf32> to vector<1x128xf32>
    %52 = vector.broadcast %51 : vector<1x128xf32> to vector<8x128xf32>
    %53 = arith.mulf %6, %52 : vector<8x128xf32>
    %54 = arith.addf %50, %53 : vector<8x128xf32>
    %55 = vector.extract_strided_slice %43 {offsets = [3, 0], sizes = [1, 128], strides = [1, 1]} : vector<8x128xf32> to vector<1x128xf32>
    %56 = vector.broadcast %55 : vector<1x128xf32> to vector<8x128xf32>
    %57 = arith.mulf %8, %56 : vector<8x128xf32>
    %58 = arith.addf %54, %57 : vector<8x128xf32>
    %59 = vector.extract_strided_slice %43 {offsets = [4, 0], sizes = [1, 128], strides = [1, 1]} : vector<8x128xf32> to vector<1x128xf32>
    %60 = vector.broadcast %59 : vector<1x128xf32> to vector<8x128xf32>
    %61 = arith.mulf %10, %60 : vector<8x128xf32>
    %62 = arith.addf %58, %61 : vector<8x128xf32>
    %63 = vector.broadcast %15 : vector<1x128xf32> to vector<8x128xf32>
    %64 = arith.addf %62, %63 : vector<8x128xf32>
    %cst_24 = arith.constant 0.000000e+00 : f32
    %65 = vector.broadcast %cst_24 : f32 to vector<8x128xf32>
    %66 = arith.maximumf %64, %65 : vector<8x128xf32>
    %67 = arith.truncf %66 : vector<8x128xf32> to vector<8x128xbf16>
    %cst_25 = arith.constant dense<0.000000e+00> : vector<8x128xf32>
    %68 = tpu.matmul %67, %13, %cst_25 {dimension_numbers = #tpu.dot_dimension_numbers<[1], [0], [0], [1], [0, 0, 1, 1], [], []>} : vector<8x128xbf16>, vector<128x128xbf16>, vector<8x128xf32> -> vector<8x128xf32>
    %69 = vector.extract_strided_slice %68 {offsets = [0, 0], sizes = [1, 128], strides = [1, 1]} : vector<8x128xf32> to vector<1x128xf32>
    %70 = vector.broadcast %69 : vector<1x128xf32> to vector<8x128xf32>
    %71 = arith.mulf %2, %70 : vector<8x128xf32>
    %72 = vector.extract_strided_slice %68 {offsets = [1, 0], sizes = [1, 128], strides = [1, 1]} : vector<8x128xf32> to vector<1x128xf32>
    %73 = vector.broadcast %72 : vector<1x128xf32> to vector<8x128xf32>
    %74 = arith.mulf %4, %73 : vector<8x128xf32>
    %75 = arith.addf %71, %74 : vector<8x128xf32>
    %76 = vector.extract_strided_slice %68 {offsets = [2, 0], sizes = [1, 128], strides = [1, 1]} : vector<8x128xf32> to vector<1x128xf32>
    %77 = vector.broadcast %76 : vector<1x128xf32> to vector<8x128xf32>
    %78 = arith.mulf %6, %77 : vector<8x128xf32>
    %79 = arith.addf %75, %78 : vector<8x128xf32>
    %80 = vector.extract_strided_slice %68 {offsets = [3, 0], sizes = [1, 128], strides = [1, 1]} : vector<8x128xf32> to vector<1x128xf32>
    %81 = vector.broadcast %80 : vector<1x128xf32> to vector<8x128xf32>
    %82 = arith.mulf %8, %81 : vector<8x128xf32>
    %83 = arith.addf %79, %82 : vector<8x128xf32>
    %84 = vector.extract_strided_slice %68 {offsets = [4, 0], sizes = [1, 128], strides = [1, 1]} : vector<8x128xf32> to vector<1x128xf32>
    %85 = vector.broadcast %84 : vector<1x128xf32> to vector<8x128xf32>
    %86 = arith.mulf %10, %85 : vector<8x128xf32>
    %87 = arith.addf %83, %86 : vector<8x128xf32>
    %88 = vector.broadcast %16 : vector<1x128xf32> to vector<8x128xf32>
    %89 = arith.addf %87, %88 : vector<8x128xf32>
    %c0_26 = arith.constant 0 : index
    %c0_27 = arith.constant 0 : index
    %90 = vector.load %arg4[%c0_26, %c0_27] : memref<8x128xf32, #tpu.memory_space<vmem>>, vector<8x128xf32>
    tpu.vector_store %arg4[%c0_26, %c0_27], %89 {strides = array<i32>} : memref<8x128xf32, #tpu.memory_space<vmem>>, vector<8x128xf32>,
    return
  }
}

</mosaic_0001>

<bundles_post_ra>
// kernel: gcn_forward.1
= control target key start
LH: loop header
LB: loop body
LE: loop exit
PB: predicated region body
PF: predicated region fallthrough
CT: control target
= control target key end

     0   :  { %9 = vsyncpa [#allocation3], 0  ;;  %s618_s0 = inlined_call_operand.vmem [shape: f32[8,128], index: 0, kind: input, shape index: {}]   ;;  %s619_s1 = inlined_call_operand.vmem [shape: f32[5,8,128], index: 1, kind: input, shape index: {}]   ;;  %s620_s2 = inlined_call_operand.hbm [shape: bf16[384,128], index: 2, kind: input, shape index: {}]   ;;  %s621_s3 = inlined_call_operand.vmem [shape: f32[8,128], index: 3, kind: input, shape index: {}]   ;;  %s622_s4 = inlined_call_operand.hbm [shape: f32[8,128], index: 4, kind: output, shape index: {}]  }
   0x1   :  { %10 = vsyncpa [#allocation4], 0  ;;  %s19_s17 = sshll.u32 %s620_s2, 4  ;;  %s531_s18 = smov [#allocation2]   ;;  %s20_s17 = int_to_ptr.hbm [resolvable:$true] %s19_s17 }
   0x2   :  { %s21_s19 = sshll.u32 %s531_s18, 4  ;;  %s532_s20 = smov 64   ;;  %s22_s19 = int_to_ptr.vmem [resolvable:$true] %s21_s19 }
   0x3   :  { %s533_s21 = smov 4  }
   0x4   :  { %27 = dma.hbm_to_vmem [thread:$0]  %s20_s17, 3072, %s22_s19, [#allocation3], %s532_s20, %s532_s20, %s533_s21  }
   0x5   :  { %527 = dma.done.wait [#allocation3], 3072  }
   0x6   :  { %528 = vsyncadd [#allocation3], 4294964224  ;;  %v455_v0 = vld [vmem:[#allocation2 + $0x38] sm:$0xff]  ;;  %v454_v1 = vld [vmem:[#allocation2 + $0x30] sm:$0xff]  ;;  %s534_s11 = smov [#allocation5]   ;;  %s338_s15 = sshll.u32 %s622_s4, 4  ;;  %s339_s15 = int_to_ptr.hbm [resolvable:$true] %s338_s15 }
   0x7   :  { %159 = vmatpush.bf16.msra.mxu0 %v455_v0  ;;  %v34_v2 = vld [vmem:[%s618_s0] sm:$0xff]  ;;  %v463_v3 = vld [vmem:[#allocation2 + $0x78] sm:$0xff]  ;;  %v453_v4 = vld [vmem:[#allocation2 + $0x28] sm:$0xff]  ;;  %s336_s12 = sshll.u32 %s534_s11, 4  ;;  %s337_s12 = int_to_ptr.vmem [resolvable:$true] %s336_s12 }
   0x8   :  { %v569_v5 = vld [vmem:[%s619_s1] sm:$0xff]  ;;  %v95_v6 = vperm.slane %v34_v2, 0  ;;  %v97_v7 = vperm.slane %v34_v2, 1  ;;  %v574_v8 = vld [vmem:[%s619_s1 + $0x8] sm:$0xff]  ;;  %222 = vmatpush.bf16.msra.mxu1 %v463_v3  ;;  %v462_v9 = vld [vmem:[#allocation2 + $0x70] sm:$0xff]  ;;  %v100_v12 = vperm.slane %v34_v2, 2 }
   0x9   :  { %v452_v13 = vld [vmem:[#allocation2 + $0x20] sm:$0xff]  ;;  %v581_v14 = vld [vmem:[%s619_s1 + $0x10] sm:$0xff]  ;;  %v461_v15 = vld [vmem:[#allocation2 + $0x68] sm:$0xff]  ;;  %v103_v18 = vperm.slane %v34_v2, 3  ;;  %v106_v24 = vperm.slane %v34_v2, 4 }
   0xa   :  { %v96_v10 = vmul.f32 %v95_v6, %v569_v5  ;;  %v98_v11 = vmul.f32 %v574_v8, %v97_v7  ;;  %v101_v17 = vmul.f32 %v581_v14, %v100_v12  ;;  %v451_v19 = vld [vmem:[#allocation2 + $0x18] sm:$0xff]  ;;  %v460_v21 = vld [vmem:[#allocation2 + $0x60] sm:$0xff]  ;;  %v450_v25 = vld [vmem:[#allocation2 + $0x10] sm:$0xff] }
   0xb   :  { %160 = vmatpush.bf16.msra.mxu0 %v454_v1  ;;  %v587_v20 = vld [vmem:[%s619_s1 + $0x18] sm:$0xff]  ;;  %v593_v26 = vld [vmem:[%s619_s1 + $0x20] sm:$0xff]  ;;  %v449_v30 = vld [vmem:[#allocation2 + $0x8] sm:$0xff] }
   0xc   :  { %223 = vmatpush.bf16.msra.mxu1 %v462_v9  ;;  %v99_v16 = vadd.f32 %v98_v11, %v96_v10  ;;  %v104_v23 = vmul.f32 %v587_v20, %v103_v18  ;;  %v459_v27 = vld [vmem:[#allocation2 + $0x58] sm:$0xff]  ;;  %v107_v29 = vmul.f32 %v593_v26, %v106_v24  ;;  %v458_v31 = vld [vmem:[#allocation2 + $0x50] sm:$0xff]  ;;  %v448_v33 = vld [vmem:[#allocation2] sm:$0xff] }
   0xd   :  { %v457_v35 = vld [vmem:[#allocation2 + $0x48] sm:$0xff]  ;;  %v456_v36 = vld [vmem:[#allocation2 + $0x40] sm:$0xff]  ;;  %v471_v37 = vld [vmem:[#allocation2 + $0xb8] sm:$0xff] }
   0xe   :  { %v102_v22 = vadd.f32 %v101_v17, %v99_v16  ;;  %301 = vmatpush.bf16.msra.mxu2 %v471_v37  ;;  %v470_v38 = vld [vmem:[#allocation2 + $0xb0] sm:$0xff]  ;;  %v469_v39 = vld [vmem:[#allocation2 + $0xa8] sm:$0xff]  ;;  %v476_v40 = vld [vmem:[%s621_s3] ss:$0 sm:$0xff] }
   0xf   :  { %161 = vmatpush.bf16.msra.mxu0 %v453_v4  ;;  %v468_v46 = vld [vmem:[#allocation2 + $0xa0] sm:$0xff]  ;;  %v467_v47 = vld [vmem:[#allocation2 + $0x98] sm:$0xff]  ;;  %v466_v48 = vld [vmem:[#allocation2 + $0x90] sm:$0xff] }
  0x10   :  { %224 = vmatpush.bf16.msra.mxu1 %v461_v15  ;;  %v105_v28 = vadd.f32 %v104_v23, %v102_v22  ;;  %v465_v49 = vld [vmem:[#allocation2 + $0x88] sm:$0xff]  ;;  %v464_v50 = vld [vmem:[#allocation2 + $0x80] sm:$0xff] }
  0x11   :  { %v477_v2 = vld [vmem:[%s621_s3 + $0x1] ss:$0 sm:$0xff] }
  0x12   :  { %v108_v32 = vadd.f32 %v107_v29, %v105_v28  ;;  %302 = vmatpush.bf16.msra.mxu2 %v470_v38 }
  0x13   :  { %162 = vmatpush.bf16.msra.mxu0 %v452_v13 }
  0x14   :  { %225 = vmatpush.bf16.msra.mxu1 %v460_v21  ;;  %v109_v34 = vpack.c.bf16 %v108_v32, %v108_v32 }
  0x16   :  { %303 = vmatpush.bf16.msra.mxu2 %v469_v39 }
  0x17   :  { %163 = vmatpush.bf16.msra.mxu0 %v451_v19 }
  0x18   :  { %226 = vmatpush.bf16.msra.mxu1 %v459_v27  ;;  %v478_v27 = vld [vmem:[%s621_s3 + $0x2] ss:$0 sm:$0xff] }
  0x1a   :  { %304 = vmatpush.bf16.msra.mxu2 %v468_v46 }
  0x1b   :  { %164 = vmatpush.bf16.msra.mxu0 %v450_v25 }
  0x1c   :  { %227 = vmatpush.bf16.msra.mxu1 %v458_v31 }
  0x1e   :  { %305 = vmatpush.bf16.msra.mxu2 %v467_v47 }
  0x1f   :  { %165 = vmatpush.bf16.msra.mxu0 %v449_v30 }
  0x20   :  { %228 = vmatpush.bf16.msra.mxu1 %v457_v35 }
  0x22   :  { %306 = vmatpush.bf16.msra.mxu2 %v466_v48 }
  0x23   :  { %166 = vmatpush.bf16.msra.mxu0 %v448_v33 }
  0x24   :  { %229 = vmatpush.bf16.msra.mxu1 %v456_v36 }
  0x26   :  { %167 = vmatmul.bf16.vlgmr.msra.gmra.mxu0 %v109_v34  ;;  %307 = vmatpush.bf16.msra.mxu2 %v465_v49 }
  0x2a   :  { %308 = vmatpush.bf16.msra.mxu2 %v464_v50 }
  0xa3   :  { %v168_v41 = vpop.f32.mrf.mxu0 }
  0xa4   :  { %v169_v42 = vadd.f32 %v476_v40, %v168_v41 }
  0xa6   :  { %v172_v43 = vmax.f32 %v169_v42, 0.0 }
  0xa8   :  { %v173_v44 = vpack.c.bf16 %v172_v43, %v172_v43 }
  0xaa   :  { %230 = vmatmul.bf16.vlgmr.msra.gmra.mxu1 %v173_v44 }
  0xab   :  { %v170_v45 = vpop.f32.mrf.mxu0 }
 0x127   :  { %v231_v51 = vpop.f32.mrf.mxu1 }
 0x128   :  { %v235_v52 = vperm.slane %v231_v51, 0  ;;  %v237_v53 = vperm.slane %v231_v51, 1  ;;  %v240_v54 = vperm.slane %v231_v51, 2  ;;  %v243_v57 = vperm.slane %v231_v51, 3 }
 0x129   :  { %v246_v60 = vperm.slane %v231_v51, 4 }
 0x12a   :  { %v236_v55 = vmul.f32 %v235_v52, %v569_v5  ;;  %v238_v56 = vmul.f32 %v574_v8, %v237_v53  ;;  %v241_v59 = vmul.f32 %v581_v14, %v240_v54  ;;  %v244_v62 = vmul.f32 %v587_v20, %v243_v57 }
 0x12b   :  { %v247_v1 = vmul.f32 %v593_v26, %v246_v60 }
 0x12c   :  { %v239_v58 = vadd.f32 %v238_v56, %v236_v55 }
 0x12e   :  { %v242_v61 = vadd.f32 %v241_v59, %v239_v58 }
 0x12f   :  { %v233_v63 = vpop.f32.mrf.mxu1 }
 0x130   :  { %v245_v0 = vadd.f32 %v244_v62, %v242_v61 }
 0x132   :  { %v248_v3 = vadd.f32 %v247_v1, %v245_v0 }
 0x134   :  { %v250_v4 = vadd.f32 %v477_v2, %v248_v3 }
 0x136   :  { %v251_v6 = vmax.f32 %v250_v4, 0.0 }
 0x138   :  { %v252_v7 = vpack.c.bf16 %v251_v6, %v251_v6 }
 0x13a   :  { %309 = vmatmul.bf16.vlgmr.msra.gmra.mxu2 %v252_v7 }
 0x1bd   :  { %v310_v9 = vpop.f32.mrf.mxu2 }
 0x1be   :  { %v314_v10 = vperm.slane %v310_v9, 0  ;;  %v316_v11 = vperm.slane %v310_v9, 1  ;;  %v319_v12 = vperm.slane %v310_v9, 2  ;;  %v322_v16 = vperm.slane %v310_v9, 3 }
 0x1bf   :  { %v325_v19 = vperm.slane %v310_v9, 4 }
 0x1c0   :  { %v315_v13 = vmul.f32 %v314_v10, %v569_v5  ;;  %v317_v15 = vmul.f32 %v574_v8, %v316_v11  ;;  %v320_v18 = vmul.f32 %v581_v14, %v319_v12  ;;  %v323_v21 = vmul.f32 %v587_v20, %v322_v16 }
 0x1c1   :  { %v326_v25 = vmul.f32 %v593_v26, %v325_v19 }
 0x1c2   :  { %v318_v17 = vadd.f32 %v317_v15, %v315_v13 }
 0x1c4   :  { %v321_v22 = vadd.f32 %v320_v18, %v318_v17 }
 0x1c5   :  { %v312_v23 = vpop.f32.mrf.mxu2 }
 0x1c6   :  { %v324_v24 = vadd.f32 %v323_v21, %v321_v22 }
 0x1c8   :  { %v327_v5 = vadd.f32 %v326_v25, %v324_v24 }
 0x1ca   :  { %v329_v8 = vadd.f32 %v478_v27, %v327_v5 }
 0x1cc   :  { %330 = vst [vmem:[#allocation5] sm:$0xff] %v329_v8 }
 0x1cd   :  { %341 = dma.vmem_to_hbm [thread:$0]  %s337_s12, 128, %s339_s15, [#allocation4]  }
 0x1ce   :  { %529 = dma.done.wait [#allocation4], 128  }
 0x1cf   :  { %530 = vsyncadd [#allocation4], 4294967168 }
 0x1d0   :  { %346 = vsyncpa [#allocation3], 1 }
 0x1d1   :  { %347 = vsyncpa [#allocation4], 1 }

</bundles_post_ra>
